<compile_context>
chip_gen: v7x
topology: tpu7x:2x2x1
jax: 0.10.0
libtpu: 0.0.40
codegen_flags: <defaults>
</compile_context>

<pallas_src>
import jax
import jax.numpy as jnp
from jax import lax
from jax.experimental import pallas as pl
from jax.experimental.pallas import tpu as pltpu


def _round_up(n: int, m: int) -> int:
    return ((n + m - 1) // m) * m


def _mlp_kernel(x_ref, w1_ref, b1_ref, w2_ref, b2_ref, o_ref):
    # ---- Layer 1 on the MXU: (TB, D_in) @ (D_in, H_pad), f32 accumulate ----
    h = jnp.dot(x_ref[...], w1_ref[...], preferred_element_type=jnp.float32)
    h = jnp.maximum(h + b1_ref[...], 0.0)            # bias + ReLU on the VPU

    # ---- Layer 2 on the MXU: contract H_pad, lane-dense (1, TB) result ----
    # w2_ref is a (1, H_pad) row; contracting its last dim against h's last dim
    # yields (1, TB) directly (no transpose, no large VPU temporaries).
    out = lax.dot_general(
        w2_ref[...], h,
        dimension_numbers=(((1,), (1,)), ((), ())),
        preferred_element_type=jnp.float32,
    )
    out = out + b2_ref[0]                             # scalar bias from SMEM

    o_ref[...] = out[None]                            # (1, 1, TB) lane-dense store


def mlp_regressor(x, w1, b1, w2, b2, *, block_b: int = 2048):
    """Forward pass of MLPRegressor: Linear(D_in, H) -> ReLU -> Linear(H, 1).

    x:  (B, D_in) f32
    w1: (D_in, H) f32, b1: (H,) f32
    w2: (H, 1)   f32, b2: (1,) f32
    returns (B, 1) f32
    """
    B, D_in = x.shape
    H = w1.shape[1]
    H_pad = _round_up(H, 128)                 # lane alignment for the hidden dim

    # Batch tile: big (amortize ~0.35 us/step overhead), lane-sized multiple of 128.
    TB = min(_round_up(block_b, 128), _round_up(B, 128))
    # v7x: keep >= 2 blocks when the batch allows so the "parallel" axis shards
    # across both TensorCores.
    if pl.cdiv(B, TB) < 2 and _round_up(B, 128) >= 256:
        TB = max(128, _round_up(pl.cdiv(B, 2), 128))
    num_blocks = pl.cdiv(B, TB)

    x = x.astype(jnp.float32)
    # Pad only the tiny weight/bias operands on the H axis (zero cols/rows are inert).
    w1_p = jnp.zeros((D_in, H_pad), jnp.float32).at[:, :H].set(w1)
    b1_p = jnp.zeros((1, H_pad), jnp.float32).at[0, :H].set(b1)
    w2_row = jnp.zeros((1, H_pad), jnp.float32).at[0, :H].set(w2.reshape(H))
    b2_p = b2.reshape(1).astype(jnp.float32)

    out = pl.pallas_call(
        _mlp_kernel,
        out_shape=jax.ShapeDtypeStruct((num_blocks, 1, TB), jnp.float32),
        grid=(num_blocks,),
        in_specs=[
            # x streams per batch tile (double-buffered by the Pallas pipeline);
            # last dim equals the full array dim -> valid for any D_in, no padding pass.
            pl.BlockSpec((TB, D_in), lambda i: (i, 0)),
            # Weights / biases: constant index_map -> loaded once, VMEM-resident.
            pl.BlockSpec((D_in, H_pad), lambda i: (0, 0)),
            pl.BlockSpec((1, H_pad), lambda i: (0, 0)),
            pl.BlockSpec((1, H_pad), lambda i: (0, 0)),
            # b2 is a single scalar -> SMEM, not a padded VMEM tile.
            pl.BlockSpec(memory_space=pltpu.SMEM),
        ],
        # Lane-dense output: one (1, TB) row per batch tile.
        out_specs=pl.BlockSpec((1, 1, TB), lambda i: (i, 0, 0)),
        compiler_params=pltpu.CompilerParams(
            dimension_semantics=("parallel",),   # shards across TCs on v7x
        ),
    )(x, w1_p, b1_p, w2_row, b2_p)

    # (num_blocks, 1, TB) -> flat -> drop ragged-tile rows -> (B, 1)
    return out.reshape(num_blocks * TB)[:B].reshape(B, 1)


if __name__ == "__main__":
    # Small deterministic shapes consistent with the module:
    # input_size comes from the CSV column count in the original script — pick 16.
    batch = 8
    input_size = 16
    hidden_size = 64

    key = jax.random.PRNGKey(0)
    kx, kw1, kb1, kw2, kb2 = jax.random.split(key, 5)

    x = jax.random.normal(kx, (batch, input_size), dtype=jnp.float32)
    # Deterministic synthetic parameters (PyTorch-like uniform init bounds).
    bound1 = 1.0 / (input_size ** 0.5)
    w1 = jax.random.uniform(kw1, (input_size, hidden_size), jnp.float32, -bound1, bound1)
    b1 = jax.random.uniform(kb1, (hidden_size,), jnp.float32, -bound1, bound1)
    bound2 = 1.0 / (hidden_size ** 0.5)
    w2 = jax.random.uniform(kw2, (hidden_size, 1), jnp.float32, -bound2, bound2)
    b2 = jax.random.uniform(kb2, (1,), jnp.float32, -bound2, bound2)

    out = mlp_regressor(x, w1, b1, w2, b2)
    out = jax.block_until_ready(out)

    # Pure-JAX reference check.
    ref = jnp.maximum(x @ w1 + b1, 0.0) @ w2 + b2
    assert out.shape == (batch, 1)
    assert jnp.allclose(out, ref, atol=1e-5, rtol=1e-5)

    print("KERNEL_OK")
</pallas_src>

<mosaic_0001>
module attributes {stable_mosaic.version = 11 : i64} {
  func.func @_mlp_kernel(%arg0: i32, %arg1: memref<128x16xf32, #tpu.memory_space<vmem>>, %arg2: memref<16x128xf32, #tpu.memory_space<vmem>>, %arg3: memref<1x128xf32, #tpu.memory_space<vmem>>, %arg4: memref<1x128xf32, #tpu.memory_space<vmem>>, %arg5: memref<1xf32, #tpu.memory_space<smem>>, %arg6: memref<1x1x128xf32, #tpu.memory_space<vmem>>) attributes {dimension_semantics = [#tpu.dimension_semantics<parallel>], iteration_bounds = array<i64: 1>, scalar_prefetch = 0 : i64, scratch_operands = 0 : i64, tpu.core_type = #tpu.core_type<tc>, window_params = [{transform_indices = @transform_0, window_bounds = array<i64: 128, 16>}, {pipeline_mode = #tpu.pipeline_mode<synchronous>, transform_indices = @transform_1, window_bounds = array<i64: 16, 128>}, {pipeline_mode = #tpu.pipeline_mode<synchronous>, transform_indices = @transform_2, window_bounds = array<i64: 1, 128>}, {pipeline_mode = #tpu.pipeline_mode<synchronous>, transform_indices = @transform_3, window_bounds = array<i64: 1, 128>}, {transform_indices = @transform_4, window_bounds = array<i64: 1>}, {transform_indices = @transform_5, window_bounds = array<i64: 1, 1, 128>}]} {
    %c0 = arith.constant 0 : index
    %c0_0 = arith.constant 0 : index
    %0 = vector.load %arg1[%c0, %c0_0] : memref<128x16xf32, #tpu.memory_space<vmem>>, vector<128x16xf32>
    %c0_1 = arith.constant 0 : index
    %c0_2 = arith.constant 0 : index
    %1 = vector.load %arg2[%c0_1, %c0_2] : memref<16x128xf32, #tpu.memory_space<vmem>>, vector<16x128xf32>
    %cst = arith.constant dense<0.000000e+00> : vector<128x128xf32>
    %2 = tpu.matmul %0, %1, %cst {dimension_numbers = #tpu.dot_dimension_numbers<[1], [0], [0], [1], [0, 0, 1, 1], [], []>} : vector<128x16xf32>, vector<16x128xf32>, vector<128x128xf32> -> vector<128x128xf32>
    %c0_3 = arith.constant 0 : index
    %c0_4 = arith.constant 0 : index
    %3 = vector.load %arg3[%c0_3, %c0_4] : memref<1x128xf32, #tpu.memory_space<vmem>>, vector<1x128xf32>
    %4 = vector.broadcast %3 : vector<1x128xf32> to vector<128x128xf32>
    %5 = arith.addf %2, %4 : vector<128x128xf32>
    %cst_5 = arith.constant 0.000000e+00 : f32
    %6 = vector.broadcast %cst_5 : f32 to vector<128x128xf32>
    %7 = arith.maximumf %5, %6 : vector<128x128xf32>
    %c0_6 = arith.constant 0 : index
    %c0_7 = arith.constant 0 : index
    %8 = vector.load %arg4[%c0_6, %c0_7] : memref<1x128xf32, #tpu.memory_space<vmem>>, vector<1x128xf32>
    %cst_8 = arith.constant dense<0.000000e+00> : vector<1x128xf32>
    %9 = tpu.matmul %8, %7, %cst_8 {dimension_numbers = #tpu.dot_dimension_numbers<[1], [1], [0], [0], [0, 0, 1, 0], [], []>} : vector<1x128xf32>, vector<128x128xf32>, vector<1x128xf32> -> vector<1x128xf32>
    %c0_9 = arith.constant 0 : index
    %10 = memref.load %arg5[%c0_9] : memref<1xf32, #tpu.memory_space<smem>>
    %11 = vector.broadcast %10 : f32 to vector<1x128xf32>
    %12 = arith.addf %9, %11 : vector<1x128xf32>
    %13 = vector.shape_cast %12 : vector<1x128xf32> to vector<1x1x128xf32>
    %c0_10 = arith.constant 0 : index
    %c0_11 = arith.constant 0 : index
    %c0_12 = arith.constant 0 : index
    %14 = vector.load %arg6[%c0_10, %c0_11, %c0_12] : memref<1x1x128xf32, #tpu.memory_space<vmem>>, vector<1x1x128xf32>
    tpu.vector_store %arg6[%c0_10, %c0_11, %c0_12], %13 {strides = array<i32>} : memref<1x1x128xf32, #tpu.memory_space<vmem>>, vector<1x1x128xf32>,
    return
  }
  func.func @transform_0(%arg0: i32) -> (i32, i32) {
    %c0_i32 = arith.constant 0 : i32
    %c0_i32_0 = arith.constant 0 : i32
    return %arg0, %c0_i32 : i32, i32
  }
  func.func @transform_1(%arg0: i32) -> (i32, i32) {
    %c0_i32 = arith.constant 0 : i32
    %c0_i32_0 = arith.constant 0 : i32
    %c0_i32_1 = arith.constant 0 : i32
    return %c0_i32, %c0_i32_0 : i32, i32
  }
  func.func @transform_2(%arg0: i32) -> (i32, i32) {
    %c0_i32 = arith.constant 0 : i32
    %c0_i32_0 = arith.constant 0 : i32
    %c0_i32_1 = arith.constant 0 : i32
    return %c0_i32, %c0_i32_0 : i32, i32
  }
  func.func @transform_3(%arg0: i32) -> (i32, i32) {
    %c0_i32 = arith.constant 0 : i32
    %c0_i32_0 = arith.constant 0 : i32
    %c0_i32_1 = arith.constant 0 : i32
    return %c0_i32, %c0_i32_0 : i32, i32
  }
  func.func @transform_4(%arg0: i32) -> i32 {
    %c0_i32 = arith.constant 0 : i32
    %c0_i32_0 = arith.constant 0 : i32
    return %c0_i32 : i32
  }
  func.func @transform_5(%arg0: i32) -> (i32, i32, i32) {
    %c0_i32 = arith.constant 0 : i32
    %c0_i32_0 = arith.constant 0 : i32
    %c0_i32_1 = arith.constant 0 : i32
    return %arg0, %c0_i32, %c0_i32_0 : i32, i32, i32
  }
}

</mosaic_0001>

<bundles_post_ra>
// kernel: tpu_custom_call.1
= control target key start
LH: loop header
LB: loop body
LE: loop exit
PB: predicated region body
PF: predicated region fallthrough
CT: control target
= control target key end

     0   :  { %11 = vsyncpa [#allocation4], 0  ;;  %s705_s0 = inlined_call_operand.hbm [shape: f32[8,16], index: 0, kind: input, shape index: {}]   ;;  %s706_s1 = inlined_call_operand.hbm [shape: f32[16,128], index: 1, kind: input, shape index: {}]   ;;  %s707_s2 = inlined_call_operand.vmem [shape: f32[1,128], index: 2, kind: input, shape index: {}]   ;;  %s708_s3 = inlined_call_operand.vmem [shape: f32[1,128], index: 3, kind: input, shape index: {}]   ;;  %s709_s4 = inlined_call_operand.<no memory space> [shape: f32[1], index: 4, kind: input, shape index: {}]   ;;  %s710_s5 = inlined_call_operand.hbm [shape: f32[1,1,128], index: 5, kind: output, shape index: {}]  }
   0x1   :  { %12 = vsyncpa [#allocation7], 0 }
   0x2   :  { %13 = vsyncpa [#allocation5], 0 }
   0x3   :  { %18 = vsyncadd [#allocation4], 1920  ;;  %s598_s18 = smov [#allocation3]   ;;  %s526_s22 = scalar_lea.hbm %s705_s0, 128 }
   0x4   :  { %s19_s19 = sshll.u32 %s598_s18, 4  ;;  %p527_p0 = scmp.ne.s32.totalorder %s705_s0, %s526_s22  ;;  %s20_s19 = int_to_ptr.vmem [resolvable:$true] %s19_s19 }
   0x5   :  { %p530_p1 = scmp.lt.u32.totalorder %s526_s22, %s705_s0 }
   0x7   :  { %p532_p2 = pnand %p530_p1, %p527_p0 }
   0x9   :  { %535 = shalt.err (!%p532_p2)
}
   0xa   :  { %s536_s27 = scalar_lea.vmem %s20_s19, 128  ;;  %s540_s28 = scalar_lea.vmem %s20_s19, 2048 }
   0xb   :  { %p537_p3 = scmp.ne.s32.totalorder %s20_s19, %s536_s27  ;;  %p541_p4 = scmp.lt.s32.totalorder %s20_s19, %s20_s19 }
   0xc   :  { %p542_p5 = scmp.lt.s32.totalorder %s540_s28, %s536_s27 }
   0xe   :  { %p543_p6 = por %p542_p5, %p541_p4 }
  0x10   :  { %p544_p7 = pnand %p543_p6, %p537_p3 }
  0x12   :  { %547 = shalt.err (!%p544_p7)
}
  0x13   :  { %s599_s29 = smov 128   ;;  %s600_s30 = smov 8  }
  0x14   :  { %25 = dma.hbm_to_vmem [thread:$0]  %s705_s0, 128, %s20_s19, [#allocation4], %s599_s29, %s599_s29, %s600_s30  }
  0x15   :  { %s601_s8 = smov [#allocation6]   ;;  %s548_s12 = scalar_lea.hbm %s706_s1, 256 }
  0x16   :  { %s31_s9 = sshll.u32 %s601_s8, 4  ;;  %p549_p8 = scmp.ne.s32.totalorder %s706_s1, %s548_s12  ;;  %s32_s9 = int_to_ptr.vmem [resolvable:$true] %s31_s9 }
  0x17   :  { %p552_p9 = scmp.lt.u32.totalorder %s548_s12, %s706_s1 }
  0x19   :  { %p554_p10 = pnand %p552_p9, %p549_p8 }
  0x1b   :  { %557 = shalt.err (!%p554_p10)
}
  0x1c   :  { %s558_s17 = scalar_lea.vmem %s32_s9, 256  ;;  %p563_p12 = scmp.lt.s32.totalorder %s32_s9, %s32_s9 }
  0x1d   :  { %p559_p11 = scmp.ne.s32.totalorder %s32_s9, %s558_s17  ;;  %p564_p13 = scmp.lt.s32.totalorder %s558_s17, %s558_s17 }
  0x1f   :  { %p565_p0 = por %p564_p13, %p563_p12 }
  0x21   :  { %p566_p1 = pnand %p565_p0, %p559_p11 }
  0x23   :  { %569 = shalt.err (!%p566_p1)
}
  0x24   :  { %37 = dma.hbm_to_vmem [thread:$0]  %s706_s1, 256, %s32_s9, [#allocation7], %s599_s29, %s599_s29, %s600_s30  }
  0x25   :  { %592 = dma.done.wait [#allocation4], 2048  }
  0x26   :  { %593 = vsyncadd [#allocation4], 4294965248 }
  0x27   :  { %594 = dma.done.wait [#allocation7], 256  }
  0x28   :  { %595 = vsyncadd [#allocation7], 4294967040  ;;  %vm75_vm0 = vcmask 130048   ;;  %v66_v0 = vld [vmem:[#allocation6] sm:$0xff]  ;;  %v67_v1 = vld [vmem:[#allocation6 + $0x8] sm:$0xff]  ;;  %v602_v19 = vmov 0.0|0.0  }
  0x29   :  { %v50_v2 = vld [vmem:[#allocation3] sm:$0xff]  ;;  %v490_v3 = vpack.c.bf16 %v67_v1, %v66_v0  ;;  %v51_v4 = vld [vmem:[#allocation3 + $0x8] sm:$0xff]  ;;  %v52_v5 = vld [vmem:[#allocation3 + $0x10] sm:$0xff]  ;;  %494 = vmatprep.subr.bf16.mxu1 %v602_v19  ;;  %vm603_vm1 = vmmov 0   ;;  %v604_v20 = vmov 0.0   ;;  %s605_s23 = smov [#allocation8]  }
  0x2a   :  { %431 = vmatprep.mubr.msk.f32.mxu0 %vm75_vm0, %v50_v2  ;;  %v53_v6 = vld [vmem:[#allocation3 + $0x18] sm:$0xff]  ;;  %v54_v7 = vld [vmem:[#allocation3 + $0x20] sm:$0xff]  ;;  %v55_v8 = vld [vmem:[#allocation3 + $0x28] sm:$0xff]  ;;  %487 = vmatprep.mubr.msk.f32.mxu1 %vm603_vm1, %v604_v20  ;;  %s365_s24 = sshll.u32 %s605_s23, 4  ;;  %s366_s24 = int_to_ptr.vmem [resolvable:$true] %s365_s24 }
  0x2b   :  { %491 = vmatprep.subr.bf16.mxu0 %v490_v3  ;;  %v56_v9 = vld [vmem:[#allocation3 + $0x30] sm:$0xff]  ;;  %v57_v10 = vld [vmem:[#allocation3 + $0x38] sm:$0xff]  ;;  %v58_v11 = vld [vmem:[#allocation3 + $0x40] sm:$0xff]  ;;  %s570_s25 = scalar_lea.vmem %s366_s24, 16  ;;  %s574_s26 = scalar_lea.vmem %s366_s24, 32 }
  0x2c   :  { %493 = vmatpush3.bf16.msra.mxu0 %v490_v3  ;;  %v59_v12 = vld [vmem:[#allocation3 + $0x48] sm:$0xff]  ;;  %v60_v13 = vld [vmem:[#allocation3 + $0x50] sm:$0xff]  ;;  %v61_v14 = vld [vmem:[#allocation3 + $0x58] sm:$0xff]  ;;  %p571_p2 = scmp.ne.s32.totalorder %s366_s24, %s570_s25  ;;  %p575_p3 = scmp.lt.s32.totalorder %s366_s24, %s366_s24 }
  0x2d   :  { %v62_v15 = vld [vmem:[#allocation3 + $0x60] sm:$0xff]  ;;  %v63_v16 = vld [vmem:[#allocation3 + $0x68] sm:$0xff]  ;;  %v64_v17 = vld [vmem:[#allocation3 + $0x70] sm:$0xff]  ;;  %p576_p4 = scmp.lt.s32.totalorder %s574_s26, %s570_s25 }
  0x2e   :  { %v65_v18 = vld [vmem:[#allocation3 + $0x78] sm:$0xff]  ;;  %v375_v21 = vld [vmem:[%s707_s2] ss:$0 sm:$0xff] }
  0x2f   :  { %432 = vmatmul.mubr.msk.f32.vlgmr.msra.gmra.mrb[0].mxu0 %vm75_vm0, %v51_v4  ;;  %p577_p5 = por %p576_p4, %p575_p3 }
  0x30   :  { %434 = vmatprep.mubr.msk.f32.mxu0 %vm75_vm0, %v52_v5 }
  0x31   :  { %p578_p6 = pnand %p577_p5, %p571_p2 }
  0x33   :  { %435 = vmatmul.mubr.msk.f32.gmra.mrb[2].mxu0 %vm75_vm0, %v53_v6 }
  0x34   :  { %437 = vmatprep.mubr.msk.f32.mxu0 %vm75_vm0, %v54_v7 }
  0x37   :  { %438 = vmatmul.mubr.msk.f32.gmra.mrb[4].mxu0 %vm75_vm0, %v55_v8 }
  0x38   :  { %440 = vmatprep.mubr.msk.f32.mxu0 %vm75_vm0, %v56_v9 }
  0x3b   :  { %441 = vmatmul.mubr.msk.f32.gmra.mrb[6].mxu0 %vm75_vm0, %v57_v10 }
  0x3c   :  { %443 = vmatprep.mubr.msk.f32.mxu0 %vm75_vm0, %v58_v11 }
  0x3f   :  { %444 = vmatmul.mubr.msk.f32.gmra.mrb[8].mxu0 %vm75_vm0, %v59_v12 }
  0x40   :  { %446 = vmatprep.mubr.msk.f32.mxu0 %vm75_vm0, %v60_v13 }
  0x43   :  { %447 = vmatmul.mubr.msk.f32.gmra.mrb[10].mxu0 %vm75_vm0, %v61_v14  ;;  %v285_v14 = vld [vmem:[%s708_s3] sm:$0x1] }
  0x44   :  { %449 = vmatprep.mubr.msk.f32.mxu0 %vm75_vm0, %v62_v15  ;;  %v287_v15 = vstv %s709_s4 }
  0x47   :  { %450 = vmatmul.mubr.msk.f32.gmra.mrb[12].mxu0 %vm75_vm0, %v63_v16 }
  0x48   :  { %452 = vmatprep.mubr.msk.f32.mxu0 %vm75_vm0, %v64_v17 }
  0x4b   :  { %453 = vmatmul.mubr.msk.f32.gmra.mrb[14].mxu0 %vm75_vm0, %v65_v18 }
 0x102   :  { %v433_v22 = vpop.f32.mrb[0].mxu0 }
 0x103   :  { %v196_v23 = vadd.f32 %v433_v22, %v375_v21  ;;  %v190_v24 = vpop.f32.mrb[1].mxu0 }
 0x104   :  { %v191_v25 = vadd.f32 %v375_v21, %v190_v24 }
 0x105   :  { %v270_v26 = vmax.f32 %v196_v23, 0.0 }
 0x106   :  { %v269_v27 = vmax.f32 %v191_v25, 0.0  ;;  %v436_v28 = vpop.f32.mrb[2].mxu0 }
 0x107   :  { %v206_v29 = vadd.f32 %v436_v28, %v375_v21  ;;  %v200_v30 = vpop.f32.mrb[3].mxu0 }
 0x108   :  { %v201_v31 = vadd.f32 %v375_v21, %v200_v30  ;;  %v495_v32 = vpack.c.bf16 %v270_v26, %v269_v27 }
 0x109   :  { %v272_v33 = vmax.f32 %v206_v29, 0.0 }
 0x10a   :  { %v271_v34 = vmax.f32 %v201_v31, 0.0  ;;  %496 = vmatpush3.bf16.xpose.msra.mxu1 %v495_v32  ;;  %v439_v35 = vpop.f32.mrb[4].mxu0 }
 0x10b   :  { %v216_v36 = vadd.f32 %v439_v35, %v375_v21  ;;  %497 = vmatprep.subr.bf16.mxu1 %v602_v19  ;;  %v210_v37 = vpop.f32.mrb[5].mxu0 }
 0x10c   :  { %v498_v38 = vpack.c.bf16 %v272_v33, %v271_v34  ;;  %v211_v39 = vadd.f32 %v375_v21, %v210_v37 }
 0x10d   :  { %v274_v40 = vmax.f32 %v216_v36, 0.0 }
 0x10e   :  { %v273_v41 = vmax.f32 %v211_v39, 0.0  ;;  %v442_v42 = vpop.f32.mrb[6].mxu0 }
 0x10f   :  { %v226_v43 = vadd.f32 %v442_v42, %v375_v21  ;;  %v220_v44 = vpop.f32.mrb[7].mxu0 }
 0x110   :  { %v501_v45 = vpack.c.bf16 %v274_v40, %v273_v41  ;;  %v221_v46 = vadd.f32 %v375_v21, %v220_v44 }
 0x111   :  { %v276_v47 = vmax.f32 %v226_v43, 0.0 }
 0x112   :  { %499 = vmatpush3.bf16.xpose.msra.mxu1 %v498_v38  ;;  %v275_v48 = vmax.f32 %v221_v46, 0.0  ;;  %v445_v49 = vpop.f32.mrb[8].mxu0 }
 0x113   :  { %500 = vmatprep.subr.bf16.mxu1 %v602_v19  ;;  %v236_v50 = vadd.f32 %v445_v49, %v375_v21  ;;  %v230_v51 = vpop.f32.mrb[9].mxu0 }
 0x114   :  { %v504_v52 = vpack.c.bf16 %v276_v47, %v275_v48  ;;  %v231_v53 = vadd.f32 %v375_v21, %v230_v51 }
 0x115   :  { %v278_v54 = vmax.f32 %v236_v50, 0.0 }
 0x116   :  { %v277_v55 = vmax.f32 %v231_v53, 0.0  ;;  %v448_v56 = vpop.f32.mrb[10].mxu0 }
 0x117   :  { %v246_v57 = vadd.f32 %v448_v56, %v375_v21  ;;  %v240_v58 = vpop.f32.mrb[11].mxu0 }
 0x118   :  { %v507_v59 = vpack.c.bf16 %v278_v54, %v277_v55  ;;  %v241_v60 = vadd.f32 %v375_v21, %v240_v58 }
 0x119   :  { %v280_v61 = vmax.f32 %v246_v57, 0.0 }
 0x11a   :  { %502 = vmatpush3.bf16.xpose.msra.mxu1 %v501_v45  ;;  %v279_v62 = vmax.f32 %v241_v60, 0.0  ;;  %v451_v63 = vpop.f32.mrb[12].mxu0 }
 0x11b   :  { %503 = vmatprep.subr.bf16.mxu1 %v602_v19  ;;  %v256_v0 = vadd.f32 %v451_v63, %v375_v21  ;;  %v250_v1 = vpop.f32.mrb[13].mxu0 }
 0x11c   :  { %v510_v2 = vpack.c.bf16 %v280_v61, %v279_v62  ;;  %v251_v3 = vadd.f32 %v375_v21, %v250_v1 }
 0x11d   :  { %v282_v4 = vmax.f32 %v256_v0, 0.0 }
 0x11e   :  { %v281_v5 = vmax.f32 %v251_v3, 0.0  ;;  %v454_v6 = vpop.f32.mrb[14].mxu0 }
 0x11f   :  { %v266_v7 = vadd.f32 %v454_v6, %v375_v21  ;;  %v260_v8 = vpop.f32.mrb[15].mxu0 }
 0x120   :  { %v513_v9 = vpack.c.bf16 %v282_v4, %v281_v5  ;;  %v261_v10 = vadd.f32 %v375_v21, %v260_v8 }
 0x121   :  { %v284_v11 = vmax.f32 %v266_v7, 0.0 }
 0x122   :  { %505 = vmatpush3.bf16.xpose.msra.mxu1 %v504_v52  ;;  %v283_v12 = vmax.f32 %v261_v10, 0.0 }
 0x123   :  { %506 = vmatprep.subr.bf16.mxu1 %v602_v19 }
 0x124   :  { %v516_v13 = vpack.c.bf16 %v284_v11, %v283_v12 }
 0x12a   :  { %508 = vmatpush3.bf16.xpose.msra.mxu1 %v507_v59 }
 0x12b   :  { %509 = vmatprep.subr.bf16.mxu1 %v602_v19 }
 0x132   :  { %511 = vmatpush3.bf16.xpose.msra.mxu1 %v510_v2 }
 0x133   :  { %512 = vmatprep.subr.bf16.mxu1 %v602_v19 }
 0x13a   :  { %514 = vmatpush3.bf16.xpose.msra.mxu1 %v513_v9 }
 0x13b   :  { %515 = vmatprep.subr.bf16.mxu1 %v602_v19 }
 0x142   :  { %517 = vmatpush3.bf16.xpose.msra.mxu1 %v516_v13 }
 0x149   :  { %488 = vmatmul.mubr.f32.vlgmr.msra.gmra.mrb[0].mxu1 %v285_v14 }
 0x21c   :  { %v354_v16 = vpop.f32.mrb[0].mxu1 }
 0x21d   :  { %v355_v17 = vadd.f32 %v354_v16, %v287_v15  ;;  %v489_v18 = vpop.f32.mrb[1].mxu1 }
 0x21f   :  { %358 = vst [vmem:[#allocation8] sm:$0x1] %v355_v17 }
 0x220   :  { %581 = shalt.err (!%p578_p6)
}
 0x221   :  { %s582_s28 = scalar_lea.hbm %s710_s5, 16 }
 0x222   :  { %p583_p7 = scmp.ne.s32.totalorder %s710_s5, %s582_s28  ;;  %p586_p8 = scmp.lt.u32.totalorder %s582_s28, %s710_s5 }
 0x224   :  { %p588_p9 = pnand %p586_p8, %p583_p7 }
 0x226   :  { %591 = shalt.err (!%p588_p9)
}
 0x227   :  { %368 = dma.vmem_to_hbm [thread:$0]  %s366_s24, 16, %s710_s5, [#allocation5]  }
 0x228   :  { %596 = dma.done.wait [#allocation5], 16  }
 0x229   :  { %597 = vsyncadd [#allocation5], 4294967280 }
 0x22a   :  { %372 = vsyncpa [#allocation4], 1 }
 0x22b   :  { %373 = vsyncpa [#allocation7], 1 }
 0x22c   :  { %374 = vsyncpa [#allocation5], 1 }

</bundles_post_ra>
